<compile_context>
chip_gen: v6e
topology: v6e:2x2x1
jax: 0.10.0
libtpu: 0.0.40
codegen_flags: <defaults>
</compile_context>

<pallas_src>
import jax
import jax.numpy as jnp
from jax import lax
from jax.experimental import pallas as pl
from jax.experimental.pallas import tpu as pltpu


def _round_up(x: int, m: int) -> int:
    return (x + m - 1) // m * m


def glo_embed_kernel(idx_ref, table_ref, out_ref):
    # idx_ref   : VMEM (block_n, 1) int32       -- indices for this output tile
    # table_ref : VMEM (num_emb_pad, d_pad)     -- full table, resident (untiled)
    # out_ref   : VMEM (block_n, d_pad)         -- lane-dense output tile
    idx = idx_ref[...]                                              # (block_n, 1)
    num_emb_pad = table_ref.shape[0]
    row_ids = lax.broadcasted_iota(jnp.int32, (idx.shape[0], num_emb_pad), 1)
    onehot = (idx == row_ids).astype(table_ref.dtype)               # (block_n, E_pad)
    # One MXU matmul gathers all block_n rows at once; f32 accumulation.
    out = jnp.dot(onehot, table_ref[...], preferred_element_type=jnp.float32)
    out_ref[...] = out.astype(out_ref.dtype)


def glo_embed(indices, table, *, block_n=512):
    """Pallas equivalent of nn.Embedding(num_embeddings, D)(indices)."""
    num_emb, d = table.shape
    flat = indices.reshape(-1).astype(jnp.int32)
    n = flat.shape[0]

    # Pad table: contraction dim (rows) and output lane dim (cols) to 128.
    d_pad = _round_up(d, 128)
    num_emb_pad = _round_up(num_emb, 128)
    if (num_emb_pad, d_pad) != (num_emb, d):
        table_p = jnp.pad(table, ((0, num_emb_pad - num_emb), (0, d_pad - d)))
    else:
        table_p = table

    # Adaptive tile: large for real workloads, shrinks (multiple of 8) when N is tiny.
    block_n_eff = min(block_n, _round_up(n, 8))
    n_pad = _round_up(n, block_n_eff)
    # Padded index slots are -1 -> match no table row -> zero output rows.
    idx2 = jnp.pad(flat, (0, n_pad - n), constant_values=-1).reshape(n_pad, 1)

    grid = (n_pad // block_n_eff,)

    itemsize = jnp.dtype(table.dtype).itemsize
    table_bytes = num_emb_pad * d_pad * itemsize
    out_tile_bytes = block_n_eff * d_pad * itemsize
    idx_tile_bytes = block_n_eff * 128 * 4          # conservative (lane-padded layout)
    vmem_need = table_bytes + 2 * out_tile_bytes + 2 * idx_tile_bytes + (2 << 20)
    vmem_limit = int(min(64 * 1024 * 1024, max(vmem_need, 32 * 1024 * 1024)))

    cost = pl.CostEstimate(
        flops=int(2 * n_pad * num_emb_pad * d_pad),
        transcendentals=0,
        bytes_accessed=int(table_bytes + n_pad * 4 + n_pad * d_pad * itemsize),
    )

    out_flat = pl.pallas_call(
        glo_embed_kernel,
        out_shape=jax.ShapeDtypeStruct((n_pad, d_pad), table.dtype),
        grid=grid,
        in_specs=[
            # per-tile index block (VMEM); last dim 1 == full array extent
            pl.BlockSpec((block_n_eff, 1), lambda i: (i, 0)),
            # full table, single resident copy in VMEM (no double-buffering)
            pl.BlockSpec(memory_space=pltpu.MemorySpace.VMEM),
        ],
        out_specs=pl.BlockSpec((block_n_eff, d_pad), lambda i: (i, 0)),
        compiler_params=pltpu.CompilerParams(
            dimension_semantics=("parallel",),
            vmem_limit_bytes=vmem_limit,
        ),
        cost_estimate=cost,
    )(idx2, table_p)

    if (n_pad, d_pad) != (n, d):
        out_flat = out_flat[:n, :d]
    return out_flat.reshape(indices.shape + (d,))


if __name__ == "__main__":
    key = jax.random.PRNGKey(0)
    k_table, k_idx = jax.random.split(key)

    num_embeddings = 16
    embedding_dim = 32

    # Deterministic "parameters": nn.Embedding default init is N(0, 1).
    table = jax.random.normal(k_table, (num_embeddings, embedding_dim),
                              dtype=jnp.float32)

    # Small index batch (B=2, S=8), as a GLO latent-code lookup would use.
    indices = jax.random.randint(k_idx, (2, 8), 0, num_embeddings,
                                 dtype=jnp.int32)

    out = glo_embed(indices, table)
    out = jax.block_until_ready(out)

    # Reference check against plain JAX gather (== torch nn.Embedding semantics).
    ref = jnp.take(table, indices, axis=0)
    assert out.shape == (2, 8, embedding_dim)
    assert out.dtype == jnp.float32
    assert jnp.allclose(out, ref), "Pallas embedding lookup mismatch"

    print("KERNEL_OK")
</pallas_src>

<mosaic_0001>
module attributes {stable_mosaic.version = 11 : i64} {
  func.func @glo_embed_kernel(%arg0: i32, %arg1: memref<16x1xi32, #tpu.memory_space<vmem>>, %arg2: memref<128x128xf32, #tpu.memory_space<vmem>>, %arg3: memref<16x128xf32, #tpu.memory_space<vmem>>) attributes {dimension_semantics = [#tpu.dimension_semantics<parallel>], iteration_bounds = array<i64: 1>, scalar_prefetch = 0 : i64, scratch_operands = 0 : i64, tpu.core_type = #tpu.core_type<tc>, window_params = [{transform_indices = @transform_0, window_bounds = array<i64: 16, 1>}, {pipeline_mode = #tpu.pipeline_mode<synchronous>, transform_indices = @transform_1, window_bounds = array<i64: 128, 128>}, {transform_indices = @transform_2, window_bounds = array<i64: 16, 128>}]} {
    %c0 = arith.constant 0 : index
    %c0_0 = arith.constant 0 : index
    %0 = vector.load %arg1[%c0, %c0_0] : memref<16x1xi32, #tpu.memory_space<vmem>>, vector<16x1xi32>
    %1 = tpu.iota {dimensions = array<i32: 1>} : vector<16x128xi32>
    %2 = vector.broadcast %0 : vector<16x1xi32> to vector<16x128xi32>
    %3 = arith.cmpi eq, %2, %1 : vector<16x128xi32>
    %4 = arith.extui %3 : vector<16x128xi1> to vector<16x128xi32>
    %5 = arith.sitofp %4 : vector<16x128xi32> to vector<16x128xf32>
    %c0_1 = arith.constant 0 : index
    %c0_2 = arith.constant 0 : index
    %6 = vector.load %arg2[%c0_1, %c0_2] : memref<128x128xf32, #tpu.memory_space<vmem>>, vector<128x128xf32>
    %cst = arith.constant dense<0.000000e+00> : vector<16x128xf32>
    %7 = tpu.matmul %5, %6, %cst {dimension_numbers = #tpu.dot_dimension_numbers<[1], [0], [0], [1], [0, 0, 1, 1], [], []>} : vector<16x128xf32>, vector<128x128xf32>, vector<16x128xf32> -> vector<16x128xf32>
    %c0_3 = arith.constant 0 : index
    %c0_4 = arith.constant 0 : index
    %8 = vector.load %arg3[%c0_3, %c0_4] : memref<16x128xf32, #tpu.memory_space<vmem>>, vector<16x128xf32>
    tpu.vector_store %arg3[%c0_3, %c0_4], %7 {strides = array<i32>} : memref<16x128xf32, #tpu.memory_space<vmem>>, vector<16x128xf32>,
    return
  }
  func.func @transform_0(%arg0: i32) -> (i32, i32) {
    %c0_i32 = arith.constant 0 : i32
    %c0_i32_0 = arith.constant 0 : i32
    return %arg0, %c0_i32 : i32, i32
  }
  func.func @transform_1(%arg0: i32) -> (i32, i32) {
    %c0_i32 = arith.constant 0 : i32
    %c0_i32_0 = arith.constant 0 : i32
    %c0_i32_1 = arith.constant 0 : i32
    return %c0_i32, %c0_i32_0 : i32, i32
  }
  func.func @transform_2(%arg0: i32) -> (i32, i32) {
    %c0_i32 = arith.constant 0 : i32
    %c0_i32_0 = arith.constant 0 : i32
    return %arg0, %c0_i32 : i32, i32
  }
}

</mosaic_0001>

<bundles_post_ra>
// kernel: tpu_custom_call.1
= control target key start
LH: loop header
LB: loop body
LE: loop exit
PB: predicated region body
PF: predicated region fallthrough
CT: control target
= control target key end

     0   :  { %7 = vsyncpa [#allocation3], 0  ;;  %s299_s0 = inlined_call_operand.vmem [shape: s32[16,1], index: 0, kind: input, shape index: {}]   ;;  %s300_s1 = inlined_call_operand.hbm [shape: f32[128,128], index: 1, kind: input, shape index: {}]   ;;  %s301_s2 = inlined_call_operand.hbm [shape: f32[16,128], index: 2, kind: output, shape index: {}]  }
   0x1   :  { %8 = vsyncpa [#allocation4], 0  ;;  %s260_s9 = smov [#allocation2]  }
   0x2   :  { %s16_s10 = sshll.u32 %s260_s9, 4  ;;  %s17_s10 = int_to_ptr.vmem [resolvable:$true] %s16_s10 }
   0x3   :  { %s224_s11 = scalar_lea.vmem %s17_s10, 2048  ;;  %p229_p1 = scmp.lt.s32.totalorder %s17_s10, %s17_s10 }
   0x4   :  { %p225_p0 = scmp.ne.s32.totalorder %s17_s10, %s224_s11  ;;  %p230_p2 = scmp.lt.s32.totalorder %s224_s11, %s224_s11 }
   0x6   :  { %p231_p3 = por %p230_p2, %p229_p1 }
   0x8   :  { %p232_p4 = pnand %p231_p3, %p225_p0 }
   0xa   :  { %235 = shalt.err (!%p232_p4)
}
   0xb   :  { %s261_s12 = smov 128   ;;  %s262_s13 = smov 8  }
   0xc   :  { %22 = dma.hbm_to_vmem [thread:$0]  %s300_s1, 2048, %s17_s10, [#allocation3], %s261_s12, %s261_s12, %s262_s13  }
   0xd   :  { %256 = dma.done.wait [#allocation3], 2048  }
   0xe   :  { %257 = vsyncadd [#allocation3], 4294965248  ;;  %v263_v0 = vmov 0   ;;  %v26_v1 = vld [vmem:[%s299_s0] sm:$0xff]  ;;  %v57_v2 = vld [vmem:[#allocation2 + $0x78] sm:$0xff]  ;;  %v28_v19 = vlaneseq  ;;  %v264_v22 = vmov 1.0  }
   0xf   :  { %215 = vset.pattern.permute.xlu0 %v263_v0  ;;  %174 = vmatprep.subr.mxu0 %v57_v2  ;;  %v56_v3 = vld [vmem:[#allocation2 + $0x70] sm:$0xff]  ;;  %v27_v4 = vld [vmem:[%s299_s0 + $0x8] sm:$0xff]  ;;  %v54_v6 = vld [vmem:[#allocation2 + $0x60] sm:$0xff]  ;;  %s265_s0 = smov [#allocation5]  }
  0x10   :  { %31 = vperm.xlu0 %215, %v26_v1   ;;  %175 = vmatpush3.msra.mxu0 %v57_v2  ;;  %v55_v5 = vld [vmem:[#allocation2 + $0x68] sm:$0xff]  ;;  %v53_v7 = vld [vmem:[#allocation2 + $0x58] sm:$0xff]  ;;  %v52_v8 = vld [vmem:[#allocation2 + $0x50] sm:$0xff]  ;;  %v29_v20 = vand.u32 127, %v28_v19  ;;  %s140_s1 = sshll.u32 %s265_s0, 4  ;;  %s141_s1 = int_to_ptr.vmem [resolvable:$true] %s140_s1 }
  0x11   :  { %176 = vmatprep.subr.mxu0 %v56_v3  ;;  %v51_v9 = vld [vmem:[#allocation2 + $0x48] sm:$0xff]  ;;  %v50_v10 = vld [vmem:[#allocation2 + $0x40] sm:$0xff]  ;;  %v49_v11 = vld [vmem:[#allocation2 + $0x38] sm:$0xff]  ;;  %s236_s20 = scalar_lea.vmem %s141_s1, 256  ;;  %p241_p6 = scmp.lt.s32.totalorder %s141_s1, %s141_s1 }
  0x12   :  { %177 = vmatpush3.msra.mxu0 %v56_v3  ;;  %v48_v12 = vld [vmem:[#allocation2 + $0x30] sm:$0xff]  ;;  %v47_v13 = vld [vmem:[#allocation2 + $0x28] sm:$0xff]  ;;  %v46_v14 = vld [vmem:[#allocation2 + $0x20] sm:$0xff]  ;;  %p237_p5 = scmp.ne.s32.totalorder %s141_s1, %s236_s20  ;;  %p242_p7 = scmp.lt.s32.totalorder %s236_s20, %s236_s20 }
  0x13   :  { %178 = vmatprep.subr.mxu0 %v55_v5  ;;  %v45_v15 = vld [vmem:[#allocation2 + $0x18] sm:$0xff]  ;;  %v44_v16 = vld [vmem:[#allocation2 + $0x10] sm:$0xff]  ;;  %v43_v17 = vld [vmem:[#allocation2 + $0x8] sm:$0xff] }
  0x14   :  { %34 = vperm.xlu0 %215, %v27_v4   ;;  %179 = vmatpush3.msra.mxu0 %v55_v5  ;;  %v42_v18 = vld [vmem:[#allocation2] sm:$0xff]  ;;  %p243_p8 = por %p242_p7, %p241_p6 }
  0x15   :  { %180 = vmatprep.subr.mxu0 %v54_v6 }
  0x16   :  { %181 = vmatpush3.msra.mxu0 %v54_v6  ;;  %p244_p9 = pnand %p243_p8, %p237_p5 }
  0x17   :  { %182 = vmatprep.subr.mxu0 %v53_v7 }
  0x18   :  { %183 = vmatpush3.msra.mxu0 %v53_v7 }
  0x19   :  { %184 = vmatprep.subr.mxu0 %v52_v8 }
  0x1a   :  { %185 = vmatpush3.msra.mxu0 %v52_v8 }
  0x1b   :  { %186 = vmatprep.subr.mxu0 %v51_v9 }
  0x1c   :  { %187 = vmatpush3.msra.mxu0 %v51_v9 }
  0x1d   :  { %188 = vmatprep.subr.mxu0 %v50_v10 }
  0x1e   :  { %189 = vmatpush3.msra.mxu0 %v50_v10 }
  0x1f   :  { %190 = vmatprep.subr.mxu0 %v49_v11 }
  0x20   :  { %191 = vmatpush3.msra.mxu0 %v49_v11 }
  0x21   :  { %192 = vmatprep.subr.mxu0 %v48_v12 }
  0x22   :  { %193 = vmatpush3.msra.mxu0 %v48_v12 }
  0x23   :  { %194 = vmatprep.subr.mxu0 %v47_v13 }
  0x24   :  { %195 = vmatpush3.msra.mxu0 %v47_v13 }
  0x25   :  { %196 = vmatprep.subr.mxu0 %v46_v14 }
  0x26   :  { %197 = vmatpush3.msra.mxu0 %v46_v14 }
  0x27   :  { %198 = vmatprep.subr.mxu0 %v45_v15 }
  0x28   :  { %199 = vmatpush3.msra.mxu0 %v45_v15 }
  0x29   :  { %200 = vmatprep.subr.mxu0 %v44_v16 }
  0x2a   :  { %201 = vmatpush3.msra.mxu0 %v44_v16 }
  0x2b   :  { %202 = vmatprep.subr.mxu0 %v43_v17 }
  0x2c   :  { %203 = vmatpush3.msra.mxu0 %v43_v17 }
  0x2d   :  { %204 = vmatprep.subr.mxu0 %v42_v18 }
  0x2e   :  { %205 = vmatpush3.msra.mxu0 %v42_v18 }
  0x8b   :  { %v32_v21 = vpop.permute.xlu0 %31 }
  0x8c   :  { %vm36_vm0 = vcmp.eq.s32.totalorder %v32_v21, %v29_v20 }
  0x8d   :  { %206 = vmatprep.mubr.msk.f32.mxu0 %vm36_vm0, %v264_v22 }
  0x8f   :  { %v35_v23 = vpop.permute.xlu0 %34 }
  0x90   :  { %vm37_vm1 = vcmp.eq.s32.totalorder %v35_v23, %v29_v20 }
  0x91   :  { %207 = vmatmul.mubr.msk.f32.vlgmr.msra.gmra.mxu0 %vm37_vm1, %v264_v22 }
 0x151   :  { %v208_v24 = vpop.f32.mrf.mxu0 }
 0x152   :  { %134 = vst [vmem:[#allocation5 + $0x8] sm:$0xff] %v208_v24 }
 0x153   :  { %v124_v25 = vpop.f32.mrf.mxu0 }
 0x154   :  { %133 = vst [vmem:[#allocation5] sm:$0xff] %v124_v25 }
 0x155   :  { %247 = shalt.err (!%p244_p9)
}
 0x156   :  { %146 = dma.vmem_to_hbm [thread:$0]  %s141_s1, 256, %s301_s2, [#allocation4], %s261_s12, %s261_s12, %s262_s13  }
 0x157   :  { %258 = dma.done.wait [#allocation4], 256  }
 0x158   :  { %259 = vsyncadd [#allocation4], 4294967040 }
 0x159   :  { %150 = vsyncpa [#allocation3], 1 }
 0x15a   :  { %151 = vsyncpa [#allocation4], 1 }

</bundles_post_ra>
